<compile_context>
chip_gen: v6e
topology: v6e:2x2x1
jax: 0.10.0
libtpu: 0.0.40
codegen_flags: <defaults>
</compile_context>

<pallas_src>
import functools

import jax
import jax.numpy as jnp
from jax.experimental import pallas as pl
from jax.experimental.pallas import tpu as pltpu


def _round_up(v: int, m: int) -> int:
    return ((v + m - 1) // m) * m


@functools.lru_cache(maxsize=1)
def _vmem_capacity_bytes() -> int:
    """Physical VMEM per TensorCore (v5e/v6e: 128 MiB, v7x: 64 MiB)."""
    try:
        cap = getattr(pltpu.get_tpu_info(), "vmem_capacity_bytes", None)
        if cap:
            return int(cap)
    except Exception:
        pass
    return 128 * 1024 * 1024


def _pick_tiles(fin: int, fout_p: int, b_pad: int, out_bytes: int,
                n_tile_override):
    """Chip- and budget-aware tile sizes for the reduce / emit passes."""
    cap = _vmem_capacity_bytes()
    vmem_limit = min(int(cap * 0.85), 112 * 1024 * 1024)
    budget = vmem_limit - 8 * 1024 * 1024      # headroom for Mosaic internals

    # Resident (constant-index) blocks, conservatively counted double-buffered.
    resident = 2 * (fin * fout_p * 2 + fout_p * 4 + b_pad * fout_p * 2)

    def est_emit(tn):
        streamed = 2 * (tn * fin * 2 + tn * 4 + tn * fout_p * out_bytes)
        temps = b_pad * tn * 2 + 2 * tn * fout_p * 4
        return streamed + temps + resident

    def est_reduce(tn):
        streamed = 2 * (tn * fin * 2 + tn * 4)
        temps = b_pad * tn * 2 + b_pad * fin * 4
        scratch = b_pad * (fin + 1) * 4
        return streamed + temps + resident + scratch

    if n_tile_override is not None:
        tn1 = max(128, _round_up(int(n_tile_override), 128))
    else:
        tn1 = 1024 if cap >= (96 << 20) else 512   # v5e/v6e vs v7x
    while est_emit(tn1) > budget and tn1 > 128:
        tn1 = max(128, _round_up(tn1 // 2, 128))

    # Reduce pass only streams x + bids: use a 2-4x bigger tile when it fits.
    k = 4
    while k > 1 and est_reduce(k * tn1) > budget:
        k //= 2
    tn0 = k * tn1
    return tn0, tn1, int(vmem_limit)


def _make_reduce_kernel(b_pad: int):
    def kernel(x_ref, bid_ref, w2_ref, proj_ref, sums_ref, counts_ref):
        i = pl.program_id(0)
        tn = x_ref.shape[0]

        @pl.when(i == 0)
        def _init():
            sums_ref[...] = jnp.zeros_like(sums_ref)
            counts_ref[...] = jnp.zeros_like(counts_ref)

        # One-hot membership built directly in [B_pad, tn] orientation; bf16
        # operands (one-hot values are exact in bf16) so the segment-sum hits
        # the MXU in its native dtype with f32 accumulation, no XLU transpose.
        bid = bid_ref[...]                                            # [1, tn] i32
        giota = jax.lax.broadcasted_iota(jnp.int32, (b_pad, tn), 0)   # [B_pad, tn]
        member = bid == giota                                         # bool
        oh_bf = member.astype(jnp.bfloat16)

        sums_ref[...] += jax.lax.dot_general(
            oh_bf, x_ref[...], (((1,), (0,)), ((), ())),
            preferred_element_type=jnp.float32)
        # Counts stay in f32 (exact integers) -- cheap lane reduce.
        counts_ref[...] += jnp.sum(member.astype(jnp.float32), axis=1,
                                   keepdims=True)

        @pl.when(i == pl.num_programs(0) - 1)
        def _project():
            inv_c = 1.0 / jnp.maximum(counts_ref[...], 1.0)            # [B_pad, 1]
            mean_bf = (sums_ref[...] * inv_c).astype(jnp.bfloat16)     # [B_pad, Fin]
            proj_ref[...] = jax.lax.dot_general(
                mean_bf, w2_ref[...], (((1,), (0,)), ((), ())),
                preferred_element_type=jnp.float32).astype(proj_ref.dtype)

    return kernel


def _make_emit_kernel(b_pad: int):
    def kernel(x_ref, bid_ref, w1_ref, b_ref, proj_ref, o_ref):
        tn = x_ref.shape[0]
        bid = bid_ref[...]                                            # [1, tn]
        giota = jax.lax.broadcasted_iota(jnp.int32, (b_pad, tn), 0)   # [B_pad, tn]
        oh_bf = (bid == giota).astype(jnp.bfloat16)

        # x @ W1 : bf16 operands, f32 accumulation.
        body = jax.lax.dot_general(
            x_ref[...], w1_ref[...], (((1,), (0,)), ((), ())),
            preferred_element_type=jnp.float32)                       # [tn, Fout_p]
        # Gather-by-matmul (bf16 x bf16, f32 acc): contract the one-hot's graph
        # axis (lhs dim 0) with proj's graph axis; transpose absorbed by MXU.
        ctx = jax.lax.dot_general(
            oh_bf, proj_ref[...], (((0,), (0,)), ((), ())),
            preferred_element_type=jnp.float32)                       # [tn, Fout_p]
        o_ref[...] = (body + ctx + b_ref[...]).astype(o_ref.dtype)

    return kernel


def prepare_params(weight, bias, in_features):
    """One-time parameter prep (init time, outside the hot path): split the
    Linear weight [Fout, 2*Fin] into x-half and context-half, transpose to
    [Fin, Fout], zero-pad Fout up to a lane-dense multiple of 128, cast bf16."""
    out_features = weight.shape[0]
    fout_p = _round_up(out_features, 128)
    pad = fout_p - out_features
    w1_t = jnp.pad(weight[:, :in_features].T, ((0, 0), (0, pad))).astype(jnp.bfloat16)
    w2_t = jnp.pad(weight[:, in_features:].T, ((0, 0), (0, pad))).astype(jnp.bfloat16)
    bias_row = jnp.pad(bias, (0, pad)).astype(jnp.float32).reshape(1, fout_p)
    return w1_t, w2_t, bias_row, out_features


@functools.partial(jax.jit,
                   static_argnames=("num_graphs", "out_features", "n_tile",
                                    "out_dtype"))
def use_global_context(x, batch_id, w1_t, w2_t, bias_row, *, num_graphs,
                       out_features, n_tile=None, out_dtype=jnp.float32):
    """x: [N, Fin] f32/bf16, batch_id: [N] i32, params from prepare_params."""
    n, fin = x.shape
    fout_p = w1_t.shape[1]
    b_pad = _round_up(max(num_graphs, 1), 8)
    out_bytes = jnp.dtype(out_dtype).itemsize

    tn0, tn1, vmem_limit = _pick_tiles(fin, fout_p, b_pad, out_bytes, n_tile)

    # Tile / pad N. Every tile is a multiple of 128 (or the full padded extent)
    # so all BlockSpecs satisfy the (8, 128) divisibility rule; small-N tiles
    # round to 16 rows (bf16 packs two rows per sublane).
    if n <= tn1:
        tn1 = tn0 = max(16, _round_up(n, 16))
        n_pad = tn1
    elif n <= tn0:
        tn0 = _round_up(n, tn1)
        n_pad = tn0
    else:
        n_pad = _round_up(n, tn0)

    x_p = x if x.dtype == jnp.bfloat16 else x.astype(jnp.bfloat16)
    if n_pad != n:
        x_p = jnp.pad(x_p, ((0, n_pad - n), (0, 0)))
    # Lane-major batch ids; padded rows get -1 (never match any graph).
    bid_row = jnp.pad(batch_id.astype(jnp.int32), (0, n_pad - n),
                      constant_values=-1).reshape(1, n_pad)

    # ---- Pass 1: per-graph sums/counts -> projected means (mean @ W2, bf16) ----
    proj = pl.pallas_call(
        _make_reduce_kernel(b_pad),
        out_shape=jax.ShapeDtypeStruct((b_pad, fout_p), jnp.bfloat16),
        grid_spec=pltpu.PrefetchScalarGridSpec(
            num_scalar_prefetch=0,
            grid=(n_pad // tn0,),
            in_specs=[
                pl.BlockSpec((tn0, fin), lambda i: (i, 0)),       # x tile (bf16)
                pl.BlockSpec((1, tn0), lambda i: (0, i)),         # batch ids
                pl.BlockSpec((fin, fout_p), lambda i: (0, 0)),    # W2 (resident)
            ],
            out_specs=pl.BlockSpec((b_pad, fout_p), lambda i: (0, 0)),
            scratch_shapes=[
                pltpu.VMEM((b_pad, fin), jnp.float32),   # per-graph feature sums
                pltpu.VMEM((b_pad, 1), jnp.float32),     # per-graph node counts
            ],
        ),
        compiler_params=pltpu.CompilerParams(
            dimension_semantics=("arbitrary",),           # running reduction
            vmem_limit_bytes=vmem_limit,
        ),
    )(x_p, bid_row, w2_t)

    # ---- Pass 2: out = x @ W1 + onehot @ proj + b, N axis parallel ----
    out = pl.pallas_call(
        _make_emit_kernel(b_pad),
        out_shape=jax.ShapeDtypeStruct((n_pad, fout_p), out_dtype),
        grid_spec=pltpu.PrefetchScalarGridSpec(
            num_scalar_prefetch=0,
            grid=(n_pad // tn1,),
            in_specs=[
                pl.BlockSpec((tn1, fin), lambda i: (i, 0)),       # x tile (bf16)
                pl.BlockSpec((1, tn1), lambda i: (0, i)),         # batch ids
                pl.BlockSpec((fin, fout_p), lambda i: (0, 0)),    # W1 (resident)
                pl.BlockSpec((1, fout_p), lambda i: (0, 0)),      # bias (resident)
                pl.BlockSpec((b_pad, fout_p), lambda i: (0, 0)),  # proj (resident)
            ],
            out_specs=pl.BlockSpec((tn1, fout_p), lambda i: (i, 0)),
        ),
        compiler_params=pltpu.CompilerParams(
            # Independent output tiles: shards across both v7x TensorCores.
            dimension_semantics=("parallel",),
            vmem_limit_bytes=vmem_limit,
        ),
    )(x_p, bid_row, w1_t, bias_row, proj)

    if n_pad != n or fout_p != out_features:
        out = out[:n, :out_features]
    return out


def reference_exact(x, batch_id, weight, bias, num_graphs):
    """Pure-f32 equivalent of the PyTorch module."""
    sums = jax.ops.segment_sum(x, batch_id, num_segments=num_graphs)
    counts = jax.ops.segment_sum(jnp.ones((x.shape[0],), x.dtype), batch_id,
                                 num_segments=num_graphs)
    mean = sums / jnp.maximum(counts, 1.0)[:, None]
    gpn = mean[batch_id]
    cat = jnp.concatenate([x, gpn], axis=-1)
    return cat @ weight.T + bias


def reference_bf16_matched(x, batch_id, weight, bias, num_graphs, fin):
    """Mirrors the kernel's bf16-operand / f32-accumulation algebra
    (bf16 one-hot, bf16 projected means)."""
    xb = x.astype(jnp.bfloat16)
    w1 = weight[:, :fin].T.astype(jnp.bfloat16)
    w2 = weight[:, fin:].T.astype(jnp.bfloat16)
    member = batch_id[:, None] == jnp.arange(num_graphs)[None, :]
    oh_bf = member.astype(jnp.bfloat16)
    sums = jnp.dot(oh_bf.T, xb, preferred_element_type=jnp.float32)
    counts = jnp.sum(member.astype(jnp.float32), axis=0, keepdims=True).T
    mean_bf = (sums / jnp.maximum(counts, 1.0)).astype(jnp.bfloat16)
    proj_bf = jnp.dot(mean_bf, w2,
                      preferred_element_type=jnp.float32).astype(jnp.bfloat16)
    body = jnp.dot(xb, w1, preferred_element_type=jnp.float32)
    ctx = jnp.dot(oh_bf, proj_bf, preferred_element_type=jnp.float32)
    return body + ctx + bias.astype(jnp.float32)


if __name__ == "__main__":
    key = jax.random.PRNGKey(0)

    N = 16           # nodes
    F_IN = 32        # in_features
    F_OUT = 64       # out_features
    NUM_GRAPHS = 4   # graphs in the batch

    k_x, k_w, k_b = jax.random.split(key, 3)
    x = jax.random.normal(k_x, (N, F_IN), dtype=jnp.float32)
    batch_id = jnp.array([0, 0, 0, 0, 0, 1, 1, 1, 2, 2, 2, 2, 2, 3, 3, 3],
                         dtype=jnp.int32)

    bound = 1.0 / jnp.sqrt(2.0 * F_IN)
    weight = jax.random.uniform(k_w, (F_OUT, 2 * F_IN), jnp.float32,
                                minval=-bound, maxval=bound)
    bias = jax.random.uniform(k_b, (F_OUT,), jnp.float32,
                              minval=-bound, maxval=bound)

    # One-time parameter prep (outside the hot path).
    w1_t, w2_t, bias_row, fout = prepare_params(weight, bias, F_IN)

    out = use_global_context(x, batch_id, w1_t, w2_t, bias_row,
                             num_graphs=NUM_GRAPHS, out_features=fout)
    out = jax.block_until_ready(out)
    assert out.shape == (N, F_OUT)

    ref_b = reference_bf16_matched(x, batch_id, weight, bias, NUM_GRAPHS, F_IN)
    ref_f = reference_exact(x, batch_id, weight, bias, NUM_GRAPHS)

    # Tight check against a reference that mirrors the kernel's bf16/f32 math.
    assert jnp.allclose(out, ref_b, atol=2e-3, rtol=2e-3), \
        float(jnp.max(jnp.abs(out - ref_b)))
    # Loose check against exact f32 module semantics (bf16 operand rounding).
    assert jnp.allclose(out, ref_f, atol=5e-2, rtol=5e-2), \
        float(jnp.max(jnp.abs(out - ref_f)))

    print("KERNEL_OK")
</pallas_src>

<mosaic_0001>
module attributes {stable_mosaic.version = 11 : i64} {
  func.func @kernel(%arg0: i32, %arg1: memref<16x32xbf16, #tpu.memory_space<vmem>>, %arg2: memref<1x16xi32, #tpu.memory_space<vmem>>, %arg3: memref<32x128xbf16, #tpu.memory_space<vmem>>, %arg4: memref<1x128xf32, #tpu.memory_space<vmem>>, %arg5: memref<8x128xbf16, #tpu.memory_space<vmem>>, %arg6: memref<16x128xf32, #tpu.memory_space<vmem>>) attributes {dimension_semantics = [#tpu.dimension_semantics<parallel>], iteration_bounds = array<i64: 1>, scalar_prefetch = 0 : i64, scratch_operands = 0 : i64, tpu.core_type = #tpu.core_type<tc>, window_params = [{transform_indices = @transform_0, window_bounds = array<i64: 16, 32>}, {transform_indices = @transform_1, window_bounds = array<i64: 1, 16>}, {pipeline_mode = #tpu.pipeline_mode<synchronous>, transform_indices = @transform_2, window_bounds = array<i64: 32, 128>}, {pipeline_mode = #tpu.pipeline_mode<synchronous>, transform_indices = @transform_3, window_bounds = array<i64: 1, 128>}, {pipeline_mode = #tpu.pipeline_mode<synchronous>, transform_indices = @transform_4, window_bounds = array<i64: 8, 128>}, {transform_indices = @transform_5, window_bounds = array<i64: 16, 128>}]} {
    %c0 = arith.constant 0 : index
    %c0_0 = arith.constant 0 : index
    %0 = vector.load %arg2[%c0, %c0_0] : memref<1x16xi32, #tpu.memory_space<vmem>>, vector<1x16xi32>
    %1 = tpu.iota {dimensions = array<i32: 0>} : vector<8x16xi32>
    %2 = vector.broadcast %0 : vector<1x16xi32> to vector<8x16xi32>
    %3 = arith.cmpi eq, %2, %1 : vector<8x16xi32>
    %4 = arith.extui %3 : vector<8x16xi1> to vector<8x16xi32>
    %5 = arith.sitofp %4 : vector<8x16xi32> to vector<8x16xf32>
    %6 = arith.truncf %5 : vector<8x16xf32> to vector<8x16xbf16>
    %c0_1 = arith.constant 0 : index
    %c0_2 = arith.constant 0 : index
    %7 = vector.load %arg1[%c0_1, %c0_2] : memref<16x32xbf16, #tpu.memory_space<vmem>>, vector<16x32xbf16>
    %c0_3 = arith.constant 0 : index
    %c0_4 = arith.constant 0 : index
    %8 = vector.load %arg3[%c0_3, %c0_4] : memref<32x128xbf16, #tpu.memory_space<vmem>>, vector<32x128xbf16>
    %cst = arith.constant dense<0.000000e+00> : vector<16x128xf32>
    %9 = tpu.matmul %7, %8, %cst {dimension_numbers = #tpu.dot_dimension_numbers<[1], [0], [0], [1], [0, 0, 1, 1], [], []>} : vector<16x32xbf16>, vector<32x128xbf16>, vector<16x128xf32> -> vector<16x128xf32>
    %c0_5 = arith.constant 0 : index
    %c0_6 = arith.constant 0 : index
    %10 = vector.load %arg5[%c0_5, %c0_6] : memref<8x128xbf16, #tpu.memory_space<vmem>>, vector<8x128xbf16>
    %cst_7 = arith.constant dense<0.000000e+00> : vector<16x128xf32>
    %11 = tpu.matmul %6, %10, %cst_7 {dimension_numbers = #tpu.dot_dimension_numbers<[0], [0], [1], [1], [0, 1, 1, 1], [], []>} : vector<8x16xbf16>, vector<8x128xbf16>, vector<16x128xf32> -> vector<16x128xf32>
    %12 = arith.addf %9, %11 : vector<16x128xf32>
    %c0_8 = arith.constant 0 : index
    %c0_9 = arith.constant 0 : index
    %13 = vector.load %arg4[%c0_8, %c0_9] : memref<1x128xf32, #tpu.memory_space<vmem>>, vector<1x128xf32>
    %14 = vector.broadcast %13 : vector<1x128xf32> to vector<16x128xf32>
    %15 = arith.addf %12, %14 : vector<16x128xf32>
    %c0_10 = arith.constant 0 : index
    %c0_11 = arith.constant 0 : index
    %16 = vector.load %arg6[%c0_10, %c0_11] : memref<16x128xf32, #tpu.memory_space<vmem>>, vector<16x128xf32>
    tpu.vector_store %arg6[%c0_10, %c0_11], %15 {strides = array<i32>} : memref<16x128xf32, #tpu.memory_space<vmem>>, vector<16x128xf32>,
    return
  }
  func.func @transform_0(%arg0: i32) -> (i32, i32) {
    %c0_i32 = arith.constant 0 : i32
    %c0_i32_0 = arith.constant 0 : i32
    return %arg0, %c0_i32 : i32, i32
  }
  func.func @transform_1(%arg0: i32) -> (i32, i32) {
    %c0_i32 = arith.constant 0 : i32
    %c0_i32_0 = arith.constant 0 : i32
    return %c0_i32, %arg0 : i32, i32
  }
  func.func @transform_2(%arg0: i32) -> (i32, i32) {
    %c0_i32 = arith.constant 0 : i32
    %c0_i32_0 = arith.constant 0 : i32
    %c0_i32_1 = arith.constant 0 : i32
    return %c0_i32, %c0_i32_0 : i32, i32
  }
  func.func @transform_3(%arg0: i32) -> (i32, i32) {
    %c0_i32 = arith.constant 0 : i32
    %c0_i32_0 = arith.constant 0 : i32
    %c0_i32_1 = arith.constant 0 : i32
    return %c0_i32, %c0_i32_0 : i32, i32
  }
  func.func @transform_4(%arg0: i32) -> (i32, i32) {
    %c0_i32 = arith.constant 0 : i32
    %c0_i32_0 = arith.constant 0 : i32
    %c0_i32_1 = arith.constant 0 : i32
    return %c0_i32, %c0_i32_0 : i32, i32
  }
  func.func @transform_5(%arg0: i32) -> (i32, i32) {
    %c0_i32 = arith.constant 0 : i32
    %c0_i32_0 = arith.constant 0 : i32
    return %arg0, %c0_i32 : i32, i32
  }
}

module attributes {stable_mosaic.version = 11 : i64} {
  func.func @kernel(%arg0: i32, %arg1: memref<16x32xbf16, #tpu.memory_space<vmem>>, %arg2: memref<1x16xi32, #tpu.memory_space<vmem>>, %arg3: memref<32x128xbf16, #tpu.memory_space<vmem>>, %arg4: memref<8x128xbf16, #tpu.memory_space<vmem>>, %arg5: memref<8x32xf32, #tpu.memory_space<vmem>>, %arg6: memref<8x1xf32, #tpu.memory_space<vmem>>) attributes {dimension_semantics = [#tpu.dimension_semantics<arbitrary>], iteration_bounds = array<i64: 1>, scalar_prefetch = 0 : i64, scratch_operands = 2 : i64, tpu.core_type = #tpu.core_type<tc>, window_params = [{transform_indices = @transform_0, window_bounds = array<i64: 16, 32>}, {transform_indices = @transform_1, window_bounds = array<i64: 1, 16>}, {pipeline_mode = #tpu.pipeline_mode<synchronous>, transform_indices = @transform_2, window_bounds = array<i64: 32, 128>}, {pipeline_mode = #tpu.pipeline_mode<synchronous>, transform_indices = @transform_3, window_bounds = array<i64: 8, 128>}]} {
    %c0_i32 = arith.constant 0 : i32
    %0 = arith.cmpi eq, %arg0, %c0_i32 : i32
    %1 = arith.extui %0 : i1 to i32
    %c0_i32_0 = arith.constant 0 : i32
    %2 = arith.cmpi ne, %1, %c0_i32_0 : i32
    scf.if %2 {
      %cst_15 = arith.constant 0.000000e+00 : f32
      %25 = vector.broadcast %cst_15 : f32 to vector<8x32xf32>
      %c0_16 = arith.constant 0 : index
      %c0_17 = arith.constant 0 : index
      %26 = vector.load %arg5[%c0_16, %c0_17] : memref<8x32xf32, #tpu.memory_space<vmem>>, vector<8x32xf32>
      tpu.vector_store %arg5[%c0_16, %c0_17], %25 {strides = array<i32>} : memref<8x32xf32, #tpu.memory_space<vmem>>, vector<8x32xf32>,
      %cst_18 = arith.constant 0.000000e+00 : f32
      %27 = vector.broadcast %cst_18 : f32 to vector<8x1xf32>
      %c0_19 = arith.constant 0 : index
      %c0_20 = arith.constant 0 : index
      %28 = vector.load %arg6[%c0_19, %c0_20] : memref<8x1xf32, #tpu.memory_space<vmem>>, vector<8x1xf32>
      tpu.vector_store %arg6[%c0_19, %c0_20], %27 {strides = array<i32>} : memref<8x1xf32, #tpu.memory_space<vmem>>, vector<8x1xf32>,
    } else {
    }
    %c0 = arith.constant 0 : index
    %c0_1 = arith.constant 0 : index
    %3 = vector.load %arg2[%c0, %c0_1] : memref<1x16xi32, #tpu.memory_space<vmem>>, vector<1x16xi32>
    %4 = tpu.iota {dimensions = array<i32: 0>} : vector<8x16xi32>
    %5 = vector.broadcast %3 : vector<1x16xi32> to vector<8x16xi32>
    %6 = arith.cmpi eq, %5, %4 : vector<8x16xi32>
    %7 = arith.extui %6 : vector<8x16xi1> to vector<8x16xi32>
    %8 = arith.sitofp %7 : vector<8x16xi32> to vector<8x16xf32>
    %9 = arith.truncf %8 : vector<8x16xf32> to vector<8x16xbf16>
    %c0_2 = arith.constant 0 : index
    %c0_3 = arith.constant 0 : index
    %10 = vector.load %arg5[%c0_2, %c0_3] : memref<8x32xf32, #tpu.memory_space<vmem>>, vector<8x32xf32>
    %c0_4 = arith.constant 0 : index
    %c0_5 = arith.constant 0 : index
    %11 = vector.load %arg1[%c0_4, %c0_5] : memref<16x32xbf16, #tpu.memory_space<vmem>>, vector<16x32xbf16>
    %cst = arith.constant dense<0.000000e+00> : vector<8x32xf32>
    %12 = tpu.matmul %9, %11, %cst {dimension_numbers = #tpu.dot_dimension_numbers<[1], [0], [0], [1], [0, 0, 1, 1], [], []>} : vector<8x16xbf16>, vector<16x32xbf16>, vector<8x32xf32> -> vector<8x32xf32>
    %13 = arith.addf %10, %12 : vector<8x32xf32>
    %c0_6 = arith.constant 0 : index
    %c0_7 = arith.constant 0 : index
    %14 = vector.load %arg5[%c0_6, %c0_7] : memref<8x32xf32, #tpu.memory_space<vmem>>, vector<8x32xf32>
    tpu.vector_store %arg5[%c0_6, %c0_7], %13 {strides = array<i32>} : memref<8x32xf32, #tpu.memory_space<vmem>>, vector<8x32xf32>,
    %c0_8 = arith.constant 0 : index
    %c0_9 = arith.constant 0 : index
    %15 = vector.load %arg6[%c0_8, %c0_9] : memref<8x1xf32, #tpu.memory_space<vmem>>, vector<8x1xf32>
    %16 = arith.extui %6 : vector<8x16xi1> to vector<8x16xi32>
    %17 = arith.sitofp %16 : vector<8x16xi32> to vector<8x16xf32>
    %cst_10 = arith.constant dense<0.000000e+00> : vector<8xf32>
    %18 = vector.multi_reduction <add>, %17, %cst_10 [1] : vector<8x16xf32> to vector<8xf32>
    %19 = vector.shape_cast %18 : vector<8xf32> to vector<8x1xf32>
    %20 = arith.addf %15, %19 : vector<8x1xf32>
    %c0_11 = arith.constant 0 : index
    %c0_12 = arith.constant 0 : index
    %21 = vector.load %arg6[%c0_11, %c0_12] : memref<8x1xf32, #tpu.memory_space<vmem>>, vector<8x1xf32>
    tpu.vector_store %arg6[%c0_11, %c0_12], %20 {strides = array<i32>} : memref<8x1xf32, #tpu.memory_space<vmem>>, vector<8x1xf32>,
    %c0_i32_13 = arith.constant 0 : i32
    %22 = arith.cmpi eq, %arg0, %c0_i32_13 : i32
    %23 = arith.extui %22 : i1 to i32
    %c0_i32_14 = arith.constant 0 : i32
    %24 = arith.cmpi ne, %23, %c0_i32_14 : i32
    scf.if %24 {
      %c0_15 = arith.constant 0 : index
      %c0_16 = arith.constant 0 : index
      %25 = vector.load %arg6[%c0_15, %c0_16] : memref<8x1xf32, #tpu.memory_space<vmem>>, vector<8x1xf32>
      %cst_17 = arith.constant 1.000000e+00 : f32
      %26 = vector.broadcast %cst_17 : f32 to vector<8x1xf32>
      %27 = arith.maximumf %25, %26 : vector<8x1xf32>
      %cst_18 = arith.constant 1.000000e+00 : f32
      %28 = vector.broadcast %cst_18 : f32 to vector<8x1xf32>
      %29 = arith.divf %28, %27 : vector<8x1xf32>
      %c0_19 = arith.constant 0 : index
      %c0_20 = arith.constant 0 : index
      %30 = vector.load %arg5[%c0_19, %c0_20] : memref<8x32xf32, #tpu.memory_space<vmem>>, vector<8x32xf32>
      %31 = vector.broadcast %29 : vector<8x1xf32> to vector<8x32xf32>
      %32 = arith.mulf %30, %31 : vector<8x32xf32>
      %33 = arith.truncf %32 : vector<8x32xf32> to vector<8x32xbf16>
      %c0_21 = arith.constant 0 : index
      %c0_22 = arith.constant 0 : index
      %34 = vector.load %arg3[%c0_21, %c0_22] : memref<32x128xbf16, #tpu.memory_space<vmem>>, vector<32x128xbf16>
      %cst_23 = arith.constant dense<0.000000e+00> : vector<8x128xf32>
      %35 = tpu.matmul %33, %34, %cst_23 {dimension_numbers = #tpu.dot_dimension_numbers<[1], [0], [0], [1], [0, 0, 1, 1], [], []>} : vector<8x32xbf16>, vector<32x128xbf16>, vector<8x128xf32> -> vector<8x128xf32>
      %36 = arith.truncf %35 : vector<8x128xf32> to vector<8x128xbf16>
      %c0_24 = arith.constant 0 : index
      %c0_25 = arith.constant 0 : index
      %37 = vector.load %arg4[%c0_24, %c0_25] : memref<8x128xbf16, #tpu.memory_space<vmem>>, vector<8x128xbf16>
      tpu.vector_store %arg4[%c0_24, %c0_25], %36 {strides = array<i32>} : memref<8x128xbf16, #tpu.memory_space<vmem>>, vector<8x128xbf16>,
    } else {
    }
    return
  }
  func.func @transform_0(%arg0: i32) -> (i32, i32) {
    %c0_i32 = arith.constant 0 : i32
    %c0_i32_0 = arith.constant 0 : i32
    return %arg0, %c0_i32 : i32, i32
  }
  func.func @transform_1(%arg0: i32) -> (i32, i32) {
    %c0_i32 = arith.constant 0 : i32
    %c0_i32_0 = arith.constant 0 : i32
    return %c0_i32, %arg0 : i32, i32
  }
  func.func @transform_2(%arg0: i32) -> (i32, i32) {
    %c0_i32 = arith.constant 0 : i32
    %c0_i32_0 = arith.constant 0 : i32
    %c0_i32_1 = arith.constant 0 : i32
    return %c0_i32, %c0_i32_0 : i32, i32
  }
  func.func @transform_3(%arg0: i32) -> (i32, i32) {
    %c0_i32 = arith.constant 0 : i32
    %c0_i32_0 = arith.constant 0 : i32
    %c0_i32_1 = arith.constant 0 : i32
    return %c0_i32, %c0_i32_0 : i32, i32
  }
}

</mosaic_0001>

<bundles_post_ra>
// kernel: use_global_context.2
= control target key start
LH: loop header
LB: loop body
LE: loop exit
PB: predicated region body
PF: predicated region fallthrough
CT: control target
= control target key end

     0   :  { %v24_v0 = vlaneseq  ;;  %v212_v2 = vmov 0.0   ;;  %vm213_vm0 = vmmov 0   ;;  %vm21_vm1 = vcmask 7168   ;;  %s255_s1 = inlined_call_operand.vmem [shape: s32[1,16], index: 1, kind: input, shape index: {}]   ;;  %s256_s0 = inlined_call_operand.vmem [shape: bf16[16,32], index: 0, kind: input, shape index: {}]   ;;  %s257_s2 = inlined_call_operand.vmem [shape: bf16[32,128], index: 2, kind: input, shape index: {}]   ;;  %s258_s3 = inlined_call_operand.vmem [shape: bf16[8,128], index: 3, kind: output, shape index: {}]  }
   0x1   :  { %v177_v1 = vld [vmem:[%s255_s1] ss:$0 sm:$0xff]  ;;  %189 = vmatprep.subr.bf16.mxu0 %v212_v2  ;;  %191 = vmatprep.mubr.msk.bf16.mxu0 %vm213_vm0, %v212_v2  ;;  %vm43_vm2 = vcmask 130048   ;;  %22 = vst.msk [vmem:[#allocation3] sm:$0xff] %vm21_vm1, %v212_v2  ;;  %v214_v8 = vmov 0   ;;  %vm19_vm4 = vcmask 261120  }
   0x2   :  { %v25_v3 = vshrl.u32 %v24_v0, 7  ;;  %v207_v4 = vld [vmem:[%s256_s0] sm:$0xff]   ;;  %195 = vmatprep.subr.bf16.mxu1 %v212_v2  ;;  %199 = vmatprep.mubr.msk.bf16.mxu1 %vm213_vm0, %v212_v2  ;;  %20 = vst.msk [vmem:[#allocation2] sm:$0xff] %vm19_vm4, %v212_v2  ;;  %v208_v9 = vld [vmem:[%s257_s2 + $0x8] sm:$0xff]  }
   0x3   :  { %190 = vmatpush3.bf16.msra.mxu0 %v207_v4  ;;  %206 = vset.pattern.permute.xlu0 %v214_v8  ;;  %v209_v15 = vld [vmem:[%s257_s2] sm:$0xff]  }
   0x4   :  { %vm30_vm3 = vcmp.eq.s32.totalorder %v177_v1, %v25_v3  ;;  %196 = vmatpush3.bf16.msra.mxu1 %v208_v9 }
   0x5   :  { %v178_v5 = vsel %vm30_vm3, 1.0, %v212_v2  ;;  %197 = vmatprep.subr.bf16.mxu1 %v212_v2 }
   0x6   :  { %v91_v6 = vsel %vm43_vm2, %v178_v5, 0.0  ;;  %v33_v7 = vpack.c.bf16 %v178_v5, %v178_v5 }
   0x7   :  { %92 = vadd.xlane.f32.xlu0 %v91_v6 }
   0x8   :  { %192 = vmatmul.mubr.msk.bf16.vlgmr.msra.gmra.mxu0 %vm43_vm2, %v33_v7  ;;  %v90_v10 = vld [vmem:[#allocation3] sm:$0xff]  ;;  %198 = vmatpush3.bf16.msra.mxu1 %v209_v15 }
   0x9   :  { %v34_v17 = vld [vmem:[#allocation2] sm:$0xff] }
  0x90   :  { %v93_v11 = vpop.xlane.xlu0 %92 }
  0x91   :  { %v94_v12 = vadd.f32 %v93_v11, %v90_v10 }
  0x93   :  { %96 = vst.msk [vmem:[#allocation3] sm:$0xff] %vm21_vm1, %v94_v12 }
  0x9a   :  { %v100_v13 = vld [vmem:[#allocation3] sm:$0xff] }
  0x9b   :  { %v101_v14 = vmax.f32 %v100_v13, 1.0 }
  0x9d   :  { %210 = vrcp.f32 %v101_v14 }
  0xaa   :  { %v211_v16 = vpop.eup %210 }
  0xab   :  { %107 = vperm.xlu0 %206, %v211_v16  }
  0xc8   :  { %v81_v18 = vpop.f32.mrf.mxu0 }
  0xc9   :  { %v87_v19 = vadd.f32 %v81_v18, %v34_v17 }
  0xca   :  { %v193_v20 = vpop.f32.mrf.mxu0 }
  0xcb   :  { %89 = vst.msk [vmem:[#allocation2] sm:$0xff] %vm19_vm4, %v87_v19 }
  0xcc   :  { %v84_v21 = vpop.f32.mrf.mxu0 }
  0xce   :  { %v194_v22 = vpop.f32.mrf.mxu0 }
  0xd2   :  { %v104_v23 = vld [vmem:[#allocation2] sm:$0xff] }
 0x126   :  { %v108_v24 = vpop.permute.xlu0 %107 }
 0x127   :  { %v110_v25 = vmul.f32 %v108_v24, %v104_v23 }
 0x129   :  { %v111_v26 = vpack.c.bf16 %v110_v25, %v110_v25 }
 0x12b   :  { %200 = vmatmul.mubr.msk.bf16.vlgmr.msra.gmra.mxu1 %vm19_vm4, %v111_v26 }
 0x1eb   :  { %v165_v27 = vpop.f32.mrf.mxu1 }
 0x1ec   :  { %v171_v28 = vpack.c.bf16 %v165_v27, %v165_v27 }
 0x1ed   :  { %v201_v29 = vpop.f32.mrf.mxu1 }
 0x1ee   :  { %172 = vst [vmem:[%s258_s3] sm:$0xf] %v171_v28 }
 0x1ef   :  { %v168_v30 = vpop.f32.mrf.mxu1 }
 0x1f1   :  { %v202_v31 = vpop.f32.mrf.mxu1 }

// kernel: use_global_context.3
= control target key start
LH: loop header
LB: loop body
LE: loop exit
PB: predicated region body
PF: predicated region fallthrough
CT: control target
= control target key end

     0   :  { %v23_v1 = vlaneseq  ;;  %v252_v3 = vmov 0.0   ;;  %vm253_vm0 = vmmov 0   ;;  %vm60_vm2 = vcmask 1043456   ;;  %s308_s0 = inlined_call_operand.vmem [shape: bf16[16,32], index: 0, kind: input, shape index: {}]   ;;  %s309_s1 = inlined_call_operand.vmem [shape: s32[1,16], index: 1, kind: input, shape index: {}]   ;;  %s310_s2 = inlined_call_operand.vmem [shape: bf16[32,128], index: 2, kind: input, shape index: {}]   ;;  %s311_s3 = inlined_call_operand.vmem [shape: f32[1,128], index: 3, kind: input, shape index: {}]   ;;  %s312_s4 = inlined_call_operand.vmem [shape: bf16[8,128], index: 4, kind: input, shape index: {}]   ;;  %s313_s5 = inlined_call_operand.hbm [shape: f32[16,128], index: 5, kind: output, shape index: {}]  }
   0x1   :  { %v194_v0 = vld [vmem:[%s309_s1] ss:$0 sm:$0xff]  ;;  %v227_v2 = vld [vmem:[%s310_s2 + $0x8] sm:$0xff]   ;;  %213 = vmatprep.subr.bf16.mxu1 %v252_v3  ;;  %207 = vmatprep.subr.bf16.mxu0 %v252_v3 }
   0x2   :  { %v24_v4 = vshrl.u32 %v23_v1, 7  ;;  %214 = vmatpush3.bf16.msra.mxu1 %v227_v2  ;;  %v228_v5 = vld [vmem:[%s310_s2] sm:$0xff]   ;;  %217 = vmatprep.mubr.msk.bf16.mxu1 %vm253_vm0, %v252_v3 }
   0x3   :  { %215 = vmatprep.subr.bf16.mxu1 %v252_v3  ;;  %v39_v6 = vld [vmem:[%s312_s4] sm:$0xf]  ;;  %209 = vmatprep.mubr.msk.bf16.mxu0 %vm253_vm0, %v252_v3 }
   0x4   :  { %vm29_vm1 = vcmp.eq.s32.totalorder %v194_v0, %v24_v4 }
   0x5   :  { %10 = vsyncpa [#allocation3], 0  ;;  %v195_v7 = vsel %vm29_vm1, 1.0, %v252_v3  ;;  %v229_v8 = vld [vmem:[%s308_s0] sm:$0xff]   ;;  %v62_v9 = vsel %vm60_vm2, %v39_v6, 0  ;;  %vm122_vm3 = vcmask 261120  }
   0x6   :  { %v32_v10 = vpack.c.bf16 %v195_v7, %v195_v7  ;;  %216 = vmatpush3.bf16.msra.mxu1 %v228_v5  ;;  %208 = vmatpush3.bf16.msra.mxu0 %v62_v9  ;;  %vm56_vm4 = vcmask 64512   ;;  %v201_v17 = vld [vmem:[%s311_s3] ss:$0 sm:$0xff]  ;;  %s254_s0 = smov [#allocation2]  }
   0x7   :  { %s183_s27 = sshll.u32 %s254_s0, 4  ;;  %s184_s27 = int_to_ptr.vmem [resolvable:$true] %s183_s27 }
   0x8   :  { %40 = vxpose.xlu0.c.b16.start.end [1/1] (short) (narrow) %v32_v10, 16  ;;  %s230_s28 = scalar_lea.vmem %s184_s27, 256  ;;  %p235_p1 = scmp.lt.s32.totalorder %s184_s27, %s184_s27 }
   0x9   :  { %218 = vmatmul.mubr.msk.bf16.vlgmr.msra.gmra.mxu1 %vm122_vm3, %v229_v8  ;;  %p231_p0 = scmp.ne.s32.totalorder %s184_s27, %s230_s28  ;;  %p236_p2 = scmp.lt.s32.totalorder %s230_s28, %s230_s28 }
   0xb   :  { %p237_p3 = por %p236_p2, %p235_p1 }
   0xd   :  { %p238_p4 = pnand %p237_p3, %p231_p0 }
  0x6a   :  { %v48_v11 = vpop.trf.xlu0 }
  0x6b   :  { %210 = vmatmul.mubr.msk.bf16.vlgmr.msra.gmra.mxu0 %vm56_vm4, %v48_v11 }
  0xc9   :  { %v160_v12 = vpop.f32.mrf.mxu1 }
  0xcb   :  { %v219_v13 = vpop.f32.mrf.mxu1 }
  0xcd   :  { %v163_v14 = vpop.f32.mrf.mxu1 }
  0xcf   :  { %v220_v15 = vpop.f32.mrf.mxu1 }
 0x12b   :  { %v98_v16 = vpop.f32.mrf.mxu0 }
 0x12c   :  { %v161_v18 = vadd.f32 %v160_v12, %v98_v16 }
 0x12d   :  { %v211_v19 = vpop.f32.mrf.mxu0 }
 0x12e   :  { %v174_v20 = vadd.f32 %v201_v17, %v161_v18 }
 0x12f   :  { %v101_v21 = vpop.f32.mrf.mxu0 }
 0x130   :  { %176 = vst [vmem:[#allocation2] sm:$0xff] %v174_v20  ;;  %v164_v22 = vadd.f32 %v163_v14, %v101_v21 }
 0x131   :  { %v212_v23 = vpop.f32.mrf.mxu0 }
 0x132   :  { %v175_v24 = vadd.f32 %v201_v17, %v164_v22 }
 0x134   :  { %177 = vst [vmem:[#allocation2 + $0x8] sm:$0xff] %v175_v24 }
 0x135   :  { %241 = shalt.err (!%p238_p4)
}
 0x136   :  { %s255_s3 = smov 128   ;;  %s256_s29 = smov 8  }
 0x137   :  { %189 = dma.vmem_to_hbm [thread:$0]  %s184_s27, 256, %s313_s5, [#allocation3], %s255_s3, %s255_s3, %s256_s29  }
 0x138   :  { %250 = dma.done.wait [#allocation3], 256  }
 0x139   :  { %251 = vsyncadd [#allocation3], 4294967040 }
 0x13a   :  { %193 = vsyncpa [#allocation3], 1 }

</bundles_post_ra>
